<compile_context>
chip_gen: v6e
topology: v6e:2x2x1
jax: 0.10.0
libtpu: 0.0.40
codegen_flags: <defaults>
</compile_context>

<pallas_src>
import jax
import jax.numpy as jnp
from jax.experimental import pallas as pl
from jax.experimental.pallas import tpu as pltpu


def _gp_kernel(g_ref, out_ref, acc_ref):
    # g_ref  : (tile_B, tile_R, 128) input block (any float dtype, cast in-kernel)
    # out_ref: (tile_B, 1)           per-sample penalty, written on last reduction step
    # acc_ref: (tile_B, tile_R, 128) f32 running sum of squares (VMEM scratch)
    k = pl.program_id(1)

    @pl.when(k == 0)
    def _init():
        acc_ref[...] = jnp.zeros_like(acc_ref)

    g = g_ref[...].astype(jnp.float32)
    acc_ref[...] += g * g  # pure VPU work in the steady-state loop

    @pl.when(k == pl.num_programs(1) - 1)
    def _finalize():
        acc = acc_ref[...]
        lane_sum = jnp.sum(acc, axis=-1)                 # (tile_B, tile_R)
        ssq = jnp.sum(lane_sum, axis=-1, keepdims=True)  # (tile_B, 1)
        out_ref[...] = (jnp.sqrt(ssq) - 1.0) ** 2


def gradient_penalty_pallas(dydx_flat, *, target_block_bytes=2 * 1024 * 1024):
    """dydx_flat: (B, F) array. Returns scalar f32 loss mean_b((||dydx_b||_2 - 1)^2)."""
    B, F = dydx_flat.shape
    itemsize = jnp.dtype(dydx_flat.dtype).itemsize
    LANE = 128

    # Batch chunking: bound scratch/output tile, fill output sublanes for large B.
    tile_B = B if B <= 8 else 8
    B_pad = ((B + tile_B - 1) // tile_B) * tile_B

    # Row chunking along the feature (reduction) axis: multiple of 8 sublanes,
    # sized to ~target_block_bytes per (double-buffered) input block.
    R = -(-F // LANE)                               # ceil(F / 128)
    R_min = ((R + 7) // 8) * 8
    max_rows = max(8, (target_block_bytes // (tile_B * LANE * itemsize)) // 8 * 8)
    tile_R = min(max_rows, R_min)
    R_pad = ((R + tile_R - 1) // tile_R) * tile_R
    F_pad = R_pad * LANE

    x = dydx_flat
    if (B_pad, F_pad) != (B, F):
        # Zero padding adds nothing to the per-sample sum of squares.
        x = jnp.pad(x, ((0, B_pad - B), (0, F_pad - F)))
    x = x.reshape(B_pad, R_pad, LANE)

    grid = (B_pad // tile_B, R_pad // tile_R)

    per_sample = pl.pallas_call(
        _gp_kernel,
        out_shape=jax.ShapeDtypeStruct((B_pad, 1), jnp.float32),
        grid_spec=pltpu.PrefetchScalarGridSpec(
            num_scalar_prefetch=0,
            grid=grid,
            in_specs=[pl.BlockSpec((tile_B, tile_R, LANE), lambda i, k: (i, k, 0))],
            out_specs=pl.BlockSpec((tile_B, 1), lambda i, k: (i, 0)),
            scratch_shapes=[pltpu.VMEM((tile_B, tile_R, LANE), jnp.float32)],
        ),
        compiler_params=pltpu.CompilerParams(
            dimension_semantics=("parallel", "arbitrary"),
            vmem_limit_bytes=32 * 1024 * 1024,  # headroom beyond v5e's 16 MiB default; safe on v6e/v7x
        ),
    )(x)

    # Tiny epilogue in JAX; padded batch rows (if any) are sliced away before the mean.
    return jnp.mean(per_sample[:B, 0])


def gradient_penalty_loss(y_fn, x):
    """Equivalent of GradientPaneltyLoss.forward(y, x) where y = y_fn(x).

    torch.autograd.grad(y, x, grad_outputs=ones_like(y)) == VJP of y_fn at x
    with an all-ones cotangent.
    """
    y, vjp_fn = jax.vjp(y_fn, x)
    (dydx,) = vjp_fn(jnp.ones_like(y))
    B = dydx.shape[0]
    return gradient_penalty_pallas(dydx.reshape(B, -1))


if __name__ == "__main__":
    key = jax.random.PRNGKey(0)
    B, C, H, W = 2, 4, 16, 16
    F = C * H * W

    kx, kw, kg = jax.random.split(key, 3)
    # x: interpolated sample (NCHW, as in the PyTorch usage)
    x = jax.random.normal(kx, (B, C, H, W), dtype=jnp.float32)

    # Deterministic synthetic "critic" producing y (shape (B, 1)), so a real
    # autograd path y <- x exists, mirroring the torch usage of this loss.
    w_critic = jax.random.normal(kw, (F, 1), dtype=jnp.float32) * 0.02

    def critic(xin):
        return xin.reshape(xin.shape[0], -1) @ w_critic  # (B, 1)

    loss = gradient_penalty_loss(critic, x)
    loss = jax.block_until_ready(loss)

    # Pure-JAX reference of the kernel's reduction path.
    y_ref, vjp_fn = jax.vjp(critic, x)
    (dydx_ref,) = vjp_fn(jnp.ones_like(y_ref))
    g = dydx_ref.reshape(B, -1)
    ref = jnp.mean((jnp.sqrt(jnp.sum(g * g, axis=1)) - 1.0) ** 2)
    assert jnp.allclose(loss, ref, rtol=1e-5, atol=1e-6), (loss, ref)

    # Secondary check: odd batch + feature dim that is not a multiple of 128
    # exercises the zero-padding / reshape path of the wrapper.
    g2 = jax.random.normal(kg, (3, 300), dtype=jnp.float32)
    loss2 = jax.block_until_ready(gradient_penalty_pallas(g2))
    ref2 = jnp.mean((jnp.sqrt(jnp.sum(g2 * g2, axis=1)) - 1.0) ** 2)
    assert jnp.allclose(loss2, ref2, rtol=1e-5, atol=1e-6), (loss2, ref2)

    print("KERNEL_OK")
</pallas_src>

<mosaic_0001>
module attributes {stable_mosaic.version = 11 : i64} {
  func.func @_gp_kernel(%arg0: i32, %arg1: i32, %arg2: memref<2x8x128xf32, #tpu.memory_space<vmem>>, %arg3: memref<2x1xf32, #tpu.memory_space<vmem>>, %arg4: memref<2x8x128xf32, #tpu.memory_space<vmem>>) attributes {dimension_semantics = [#tpu.dimension_semantics<parallel>, #tpu.dimension_semantics<arbitrary>], iteration_bounds = array<i64: 1, 1>, scalar_prefetch = 0 : i64, scratch_operands = 1 : i64, tpu.core_type = #tpu.core_type<tc>, window_params = [{transform_indices = @transform_0, window_bounds = array<i64: 2, 8, 128>}, {transform_indices = @transform_1, window_bounds = array<i64: 2, 1>}]} {
    %c0_i32 = arith.constant 0 : i32
    %0 = arith.cmpi eq, %arg1, %c0_i32 : i32
    %1 = arith.extui %0 : i1 to i32
    %c0_i32_0 = arith.constant 0 : i32
    %2 = arith.cmpi ne, %1, %c0_i32_0 : i32
    scf.if %2 {
      %cst = arith.constant 0.000000e+00 : f32
      %11 = vector.broadcast %cst : f32 to vector<2x8x128xf32>
      %c0_11 = arith.constant 0 : index
      %c0_12 = arith.constant 0 : index
      %c0_13 = arith.constant 0 : index
      %12 = vector.load %arg4[%c0_11, %c0_12, %c0_13] : memref<2x8x128xf32, #tpu.memory_space<vmem>>, vector<2x8x128xf32>
      tpu.vector_store %arg4[%c0_11, %c0_12, %c0_13], %11 {strides = array<i32>} : memref<2x8x128xf32, #tpu.memory_space<vmem>>, vector<2x8x128xf32>,
    } else {
    }
    %c0 = arith.constant 0 : index
    %c0_1 = arith.constant 0 : index
    %c0_2 = arith.constant 0 : index
    %3 = vector.load %arg2[%c0, %c0_1, %c0_2] : memref<2x8x128xf32, #tpu.memory_space<vmem>>, vector<2x8x128xf32>
    %c0_3 = arith.constant 0 : index
    %c0_4 = arith.constant 0 : index
    %c0_5 = arith.constant 0 : index
    %4 = vector.load %arg4[%c0_3, %c0_4, %c0_5] : memref<2x8x128xf32, #tpu.memory_space<vmem>>, vector<2x8x128xf32>
    %5 = arith.mulf %3, %3 : vector<2x8x128xf32>
    %6 = arith.addf %4, %5 : vector<2x8x128xf32>
    %c0_6 = arith.constant 0 : index
    %c0_7 = arith.constant 0 : index
    %c0_8 = arith.constant 0 : index
    %7 = vector.load %arg4[%c0_6, %c0_7, %c0_8] : memref<2x8x128xf32, #tpu.memory_space<vmem>>, vector<2x8x128xf32>
    tpu.vector_store %arg4[%c0_6, %c0_7, %c0_8], %6 {strides = array<i32>} : memref<2x8x128xf32, #tpu.memory_space<vmem>>, vector<2x8x128xf32>,
    %c0_i32_9 = arith.constant 0 : i32
    %8 = arith.cmpi eq, %arg1, %c0_i32_9 : i32
    %9 = arith.extui %8 : i1 to i32
    %c0_i32_10 = arith.constant 0 : i32
    %10 = arith.cmpi ne, %9, %c0_i32_10 : i32
    scf.if %10 {
      %c0_11 = arith.constant 0 : index
      %c0_12 = arith.constant 0 : index
      %c0_13 = arith.constant 0 : index
      %11 = vector.load %arg4[%c0_11, %c0_12, %c0_13] : memref<2x8x128xf32, #tpu.memory_space<vmem>>, vector<2x8x128xf32>
      %cst = arith.constant dense<0.000000e+00> : vector<2x8xf32>
      %12 = vector.multi_reduction <add>, %11, %cst [2] : vector<2x8x128xf32> to vector<2x8xf32>
      %cst_14 = arith.constant dense<0.000000e+00> : vector<2xf32>
      %13 = vector.multi_reduction <add>, %12, %cst_14 [1] : vector<2x8xf32> to vector<2xf32>
      %14 = vector.shape_cast %13 : vector<2xf32> to vector<2x1xf32>
      %15 = math.sqrt %14 : vector<2x1xf32>
      %cst_15 = arith.constant 1.000000e+00 : f32
      %16 = vector.broadcast %cst_15 : f32 to vector<2x1xf32>
      %17 = arith.subf %15, %16 : vector<2x1xf32>
      %18 = arith.mulf %17, %17 : vector<2x1xf32>
      %c0_16 = arith.constant 0 : index
      %c0_17 = arith.constant 0 : index
      %19 = vector.load %arg3[%c0_16, %c0_17] : memref<2x1xf32, #tpu.memory_space<vmem>>, vector<2x1xf32>
      tpu.vector_store %arg3[%c0_16, %c0_17], %18 {strides = array<i32>} : memref<2x1xf32, #tpu.memory_space<vmem>>, vector<2x1xf32>,
    } else {
    }
    return
  }
  func.func @transform_0(%arg0: i32, %arg1: i32) -> (i32, i32, i32) {
    %c0_i32 = arith.constant 0 : i32
    %c0_i32_0 = arith.constant 0 : i32
    return %arg0, %arg1, %c0_i32 : i32, i32, i32
  }
  func.func @transform_1(%arg0: i32, %arg1: i32) -> (i32, i32) {
    %c0_i32 = arith.constant 0 : i32
    %c0_i32_0 = arith.constant 0 : i32
    return %arg0, %c0_i32 : i32, i32
  }
}

</mosaic_0001>

<bundles_post_ra>
// kernel: tpu_custom_call.1
= control target key start
LH: loop header
LB: loop body
LE: loop exit
PB: predicated region body
PF: predicated region fallthrough
CT: control target
= control target key end

     0   :  { %6 = vsyncpa [#allocation4], 0  ;;  %s110_s6 = smov [#allocation3]   ;;  %s129_s0 = inlined_call_operand.hbm [shape: f32[2,8,128], index: 0, kind: input, shape index: {}]   ;;  %s130_s1 = inlined_call_operand.vmem [shape: f32[2,1], index: 1, kind: output, shape index: {}]  }
   0x1   :  { %s12_s7 = sshll.u32 %s110_s6, 4  ;;  %s13_s7 = int_to_ptr.vmem [resolvable:$true] %s12_s7 }
   0x2   :  { %s96_s8 = scalar_lea.vmem %s13_s7, 256  ;;  %p101_p1 = scmp.lt.s32.totalorder %s13_s7, %s13_s7 }
   0x3   :  { %p97_p0 = scmp.ne.s32.totalorder %s13_s7, %s96_s8  ;;  %p102_p2 = scmp.lt.s32.totalorder %s96_s8, %s96_s8 }
   0x5   :  { %p103_p3 = por %p102_p2, %p101_p1 }
   0x7   :  { %p104_p4 = pnand %p103_p3, %p97_p0 }
   0x9   :  { %107 = shalt.err (!%p104_p4)
}
   0xa   :  { %s111_s9 = smov 128   ;;  %s112_s10 = smov 8  }
   0xb   :  { %18 = dma.hbm_to_vmem [thread:$0]  %s129_s0, 256, %s13_s7, [#allocation4], %s111_s9, %s111_s9, %s112_s10  }
   0xc   :  { %108 = dma.done.wait [#allocation4], 256  }
   0xd   :  { %109 = vsyncadd [#allocation4], 4294967040  ;;  %v28_v0 = vld [vmem:[#allocation3] sm:$0xff]  ;;  %v29_v1 = vld [vmem:[#allocation3 + $0x8] sm:$0xff]  ;;  %v49_v4 = vlaneseq  ;;  %vm59_vm0 = vcmask 1041409   ;;  %vm62_vm1 = vcmask 58368  }
   0xe   :  { %v32_v2 = vmul.f32 %v28_v0, %v28_v0  ;;  %v33_v3 = vmul.f32 %v29_v1, %v29_v1  ;;  %vm75_vm4 = vcmask 1024  }
   0xf   :  { %v50_v5 = vand.u32 127, %v49_v4  ;;  %v52_v6 = vshrl.u32 %v49_v4, 7 }
  0x10   :  { %43 = vadd.xlane.f32.xlu0 %v32_v2 }
  0x11   :  { %v53_v8 = vsub.s32 %v50_v5, %v52_v6 }
  0x14   :  { %45 = vadd.xlane.f32.xlu0 %v33_v3 }
  0x99   :  { %v44_v7 = vpop.xlane.xlu0 %43 }
  0x9a   :  { %v54_v10 = vrot.slane %v44_v7, %v53_v8 }
  0x9d   :  { %v46_v9 = vpop.xlane.xlu0 %45 }
  0x9e   :  { %v58_v11 = vrot.slane %v46_v9, %v53_v8 }
  0xa0   :  { %v60_v12 = vsel %vm59_vm0, %v58_v11, %v54_v10 }
  0xa1   :  { %v63_v13 = vsel %vm62_vm1, %v60_v12, 0.0 }
  0xa2   :  { %64 = vadd.xlane.f32.xlu1 %v63_v13 }
 0x12b   :  { %v65_v14 = vpop.xlane.xlu1 %64 }
 0x12c   :  { %86 = vrsqrt.f32 %v65_v14  ;;  %vm68_vm2 = vcmp.eq.f32.partialorder %v65_v14, inf  ;;  %v71_v17 = vand.u32 2147483648, %v65_v14  ;;  %vm70_vm3 = vcmp.eq.f32.partialorder %v65_v14, 0.0 }
 0x139   :  { %v87_v15 = vpop.eup %86 }
 0x13a   :  { %v67_v16 = vmul.f32 %v87_v15, %v65_v14 }
 0x13c   :  { %v69_v18 = vsel %vm68_vm2, %v65_v14, %v67_v16 }
 0x13d   :  { %v72_v19 = vsel %vm70_vm3, %v71_v17, %v69_v18 }
 0x13e   :  { %v82_v20 = vadd.f32 -1.0, %v72_v19 }
 0x140   :  { %v74_v21 = vmul.f32 %v82_v20, %v82_v20 }
 0x142   :  { %76 = vst.msk [vmem:[%s130_s1] sm:$0x3] %vm75_vm4, %v74_v21 }
 0x143   :  { %81 = vsyncpa [#allocation4], 1 }

</bundles_post_ra>
